<compile_context>
chip_gen: v6e
topology: v6e:2x2x1
jax: 0.10.0
libtpu: 0.0.40
codegen_flags: <defaults>
</compile_context>

<pallas_src>
import functools

import jax
import jax.numpy as jnp
from jax import lax
from jax.experimental import pallas as pl
from jax.experimental.pallas import tpu as pltpu


def _round_up(a: int, b: int) -> int:
    return ((a + b - 1) // b) * b


def _physical_vmem_bytes() -> int:
    try:
        return int(pltpu.get_tpu_info().vmem_capacity_bytes)
    except Exception:
        return 128 * 1024 * 1024      # v5e/v6e default; v7x has 64 MiB


def _gated_highway_kernel(x_ref, w_ref, b_ref, o_ref):
    """One (row, column) tile of sigmoid(x @ Wg + bg) * (x @ Wh).

    x_ref: (tm, D)      activation row tile (original dtype)
    w_ref: (2, D, tn)   [0] = Wg^T slice, [1] = Wh^T slice ([in, out] layout)
    b_ref: (1, tn)      gate-bias slice (f32)
    o_ref: (tm, tn)     output tile
    """
    x = x_ref[...].astype(w_ref.dtype)            # in-kernel VPU cast (hidden under MXU)
    dims = (((1,), (0,)), ((), ()))                # plain contraction, no transpose
    gate = lax.dot_general(x, w_ref[0], dims, preferred_element_type=jnp.float32)
    high = lax.dot_general(x, w_ref[1], dims, preferred_element_type=jnp.float32)
    gate = gate + b_ref[...]
    o_ref[...] = (jax.nn.sigmoid(gate) * high).astype(o_ref.dtype)


def prepare_gated_highway_params(w_weight, g_weight, g_bias, compute_dtype=None):
    """One-time parameter prep -- call ONCE outside the per-step path.

    w_weight / g_weight: [D, D] in PyTorch nn.Linear [out, in] layout.
    Returns (w_stack, bias2d): (2, D, D) [in, out]-layout stacked weights
    (index 0 = gate, 1 = highway) and the (1, D) f32 gate bias.
    Pass compute_dtype=jnp.bfloat16 on v6e/v7x to halve weight traffic.
    """
    cdt = compute_dtype if compute_dtype is not None else w_weight.dtype
    w_stack = jnp.stack([g_weight.T, w_weight.T], axis=0).astype(cdt)   # (2, D, D)
    bias2d = g_bias.reshape(1, -1).astype(jnp.float32)                  # (1, D)
    return w_stack, bias2d


@functools.partial(jax.jit, static_argnames=("tm", "tn", "vmem_limit_bytes"))
def gated_highway(x, w_stack, bias2d, *, tm=None, tn=None, vmem_limit_bytes=None):
    """x: [..., D]; (w_stack, bias2d) from prepare_gated_highway_params."""
    orig_shape = x.shape
    D = orig_shape[-1]
    M = 1
    for s in orig_shape[:-1]:
        M *= s
    x2d = x.reshape(M, D)

    x_size = jnp.dtype(x.dtype).itemsize
    w_size = jnp.dtype(w_stack.dtype).itemsize
    phys_vmem = _physical_vmem_bytes()

    # Row tile: bigger in the small-D / mem-bound regime; 16-row quantum for
    # 16-bit compute (sublane packing), 8 otherwise.
    quantum = 16 if min(x_size, w_size) < 4 else 8
    if tm is None:
        tm = 1024 if D <= 256 else (512 if D <= 512 else 256)
    tm = _round_up(min(tm, _round_up(M, quantum)), quantum)

    # Column tile: keep the whole (2, D, D) weight resident (single-buffered)
    # when it fits the budget; else 256-aligned column slices (v7x, large D).
    if tn is None:
        w_budget = phys_vmem // 3
        if 2 * D * D * w_size <= w_budget:
            tn = D
        else:
            tn = max(256, ((w_budget // (2 * D * w_size)) // 256) * 256)
            tn = min(tn, _round_up(D, 256))

    if vmem_limit_bytes is None:
        need = (2 * D * tn * w_size            # weight slice, Buffered(1)
                + tn * 4                        # bias slice, Buffered(1)
                + 2 * tm * D * x_size           # x tile, double-buffered
                + 2 * tm * tn * x_size          # out tile, double-buffered
                + 2 * tm * tn * 4)              # f32 gate/high intermediates
        vmem_limit_bytes = int(min(max(2 * need, 32 * 1024 * 1024),
                                   (phys_vmem * 7) // 8))

    grid = (pl.cdiv(D, tn), pl.cdiv(M, tm))     # column axis OUTER, rows inner
    out2d = pl.pallas_call(
        _gated_highway_kernel,
        out_shape=jax.ShapeDtypeStruct((M, D), x.dtype),
        grid_spec=pltpu.PrefetchScalarGridSpec(
            num_scalar_prefetch=0,
            grid=grid,
            in_specs=[
                pl.BlockSpec((tm, D), lambda j, i: (i, 0)),           # x rows
                pl.BlockSpec((2, D, tn), lambda j, i: (0, 0, j),
                             pipeline_mode=pl.Buffered(1)),           # weights
                pl.BlockSpec((1, tn), lambda j, i: (0, j),
                             pipeline_mode=pl.Buffered(1)),           # gate bias
            ],
            out_specs=pl.BlockSpec((tm, tn), lambda j, i: (i, j)),
        ),
        compiler_params=pltpu.CompilerParams(
            dimension_semantics=("arbitrary", "parallel"),
            vmem_limit_bytes=vmem_limit_bytes,
        ),
    )(x2d, w_stack, bias2d)

    return out2d.reshape(orig_shape)


def gated_highway_ref(x, w_weight, g_weight, g_bias):
    g = x @ g_weight.T + g_bias
    h = x @ w_weight.T
    return jax.nn.sigmoid(g) * h


if __name__ == "__main__":
    B, S, D = 2, 8, 32
    key = jax.random.PRNGKey(0)
    kx, kw, kg, kb = jax.random.split(key, 4)

    x = jax.random.normal(kx, (B, S, D), dtype=jnp.float32)

    # Deterministic "live" params so the compute path is exercised.
    w_weight = jax.random.normal(kw, (D, D), dtype=jnp.float32) * 0.05
    g_weight = jax.random.normal(kg, (D, D), dtype=jnp.float32) * 0.05
    g_bias = jax.random.normal(kb, (D,), dtype=jnp.float32) * 0.05

    # One-time (hoisted) parameter prep.
    w_stack, bias2d = prepare_gated_highway_params(w_weight, g_weight, g_bias)

    out = jax.block_until_ready(gated_highway(x, w_stack, bias2d))
    ref = gated_highway_ref(x, w_weight, g_weight, g_bias)
    assert out.shape == (B, S, D)
    assert jnp.allclose(out, ref, atol=1e-5, rtol=1e-5)

    # Ragged row count (M = 15): exercises the masked final row block
    # (no pad / slice round-trip anymore).
    x_odd = jax.random.normal(kx, (3, 5, D), dtype=jnp.float32)
    out_odd = jax.block_until_ready(gated_highway(x_odd, w_stack, bias2d))
    ref_odd = gated_highway_ref(x_odd, w_weight, g_weight, g_bias)
    assert out_odd.shape == (3, 5, D)
    assert jnp.allclose(out_odd, ref_odd, atol=1e-5, rtol=1e-5)

    # bf16 compute path (in-kernel activation cast); looser tolerance vs f32 ref.
    w_bf16, b_bf16 = prepare_gated_highway_params(
        w_weight, g_weight, g_bias, compute_dtype=jnp.bfloat16)
    out_bf16 = jax.block_until_ready(gated_highway(x, w_bf16, b_bf16))
    assert jnp.allclose(out_bf16, ref, atol=5e-2, rtol=5e-2)

    # Module's actual init: zero weights/bias -> gate "closed" -> output 0.
    zw = jnp.zeros((D, D), jnp.float32)
    zb = jnp.zeros((D,), jnp.float32)
    wz, bz = prepare_gated_highway_params(zw, zw, zb)
    out0 = jax.block_until_ready(gated_highway(x, wz, bz))
    assert jnp.allclose(out0, jnp.zeros_like(out0))

    print("KERNEL_OK")
</pallas_src>

<mosaic_0001>
module attributes {stable_mosaic.version = 11 : i64} {
  func.func @_gated_highway_kernel(%arg0: i32, %arg1: i32, %arg2: memref<16x32xf32, #tpu.memory_space<vmem>>, %arg3: memref<2x32x32xf32, #tpu.memory_space<vmem>>, %arg4: memref<1x32xf32, #tpu.memory_space<vmem>>, %arg5: memref<16x32xf32, #tpu.memory_space<vmem>>) attributes {dimension_semantics = [#tpu.dimension_semantics<arbitrary>, #tpu.dimension_semantics<parallel>], iteration_bounds = array<i64: 1, 1>, scalar_prefetch = 0 : i64, scratch_operands = 0 : i64, tpu.core_type = #tpu.core_type<tc>, window_params = [{transform_indices = @transform_0, window_bounds = array<i64: 16, 32>}, {pipeline_mode = #tpu.pipeline_mode<synchronous>, transform_indices = @transform_1, window_bounds = array<i64: 2, 32, 32>}, {pipeline_mode = #tpu.pipeline_mode<synchronous>, transform_indices = @transform_2, window_bounds = array<i64: 1, 32>}, {transform_indices = @transform_3, window_bounds = array<i64: 16, 32>}]} {
    %c0 = arith.constant 0 : index
    %c0_0 = arith.constant 0 : index
    %0 = vector.load %arg2[%c0, %c0_0] : memref<16x32xf32, #tpu.memory_space<vmem>>, vector<16x32xf32>
    %c0_1 = arith.constant 0 : index
    %c0_2 = arith.constant 0 : index
    %c0_3 = arith.constant 0 : index
    %1 = vector.load %arg3[%c0_1, %c0_2, %c0_3] : memref<2x32x32xf32, #tpu.memory_space<vmem>>, vector<1x32x32xf32>
    %2 = vector.shape_cast %1 : vector<1x32x32xf32> to vector<32x32xf32>
    %cst = arith.constant dense<0.000000e+00> : vector<16x32xf32>
    %3 = tpu.matmul %0, %2, %cst {dimension_numbers = #tpu.dot_dimension_numbers<[1], [0], [0], [1], [0, 0, 1, 1], [], []>} : vector<16x32xf32>, vector<32x32xf32>, vector<16x32xf32> -> vector<16x32xf32>
    %c1 = arith.constant 1 : index
    %c0_4 = arith.constant 0 : index
    %c0_5 = arith.constant 0 : index
    %4 = vector.load %arg3[%c1, %c0_4, %c0_5] : memref<2x32x32xf32, #tpu.memory_space<vmem>>, vector<1x32x32xf32>
    %5 = vector.shape_cast %4 : vector<1x32x32xf32> to vector<32x32xf32>
    %cst_6 = arith.constant dense<0.000000e+00> : vector<16x32xf32>
    %6 = tpu.matmul %0, %5, %cst_6 {dimension_numbers = #tpu.dot_dimension_numbers<[1], [0], [0], [1], [0, 0, 1, 1], [], []>} : vector<16x32xf32>, vector<32x32xf32>, vector<16x32xf32> -> vector<16x32xf32>
    %c0_7 = arith.constant 0 : index
    %c0_8 = arith.constant 0 : index
    %7 = vector.load %arg4[%c0_7, %c0_8] : memref<1x32xf32, #tpu.memory_space<vmem>>, vector<1x32xf32>
    %8 = vector.broadcast %7 : vector<1x32xf32> to vector<16x32xf32>
    %9 = arith.addf %3, %8 : vector<16x32xf32>
    %10 = arith.negf %9 : vector<16x32xf32>
    %11 = math.exp %10 : vector<16x32xf32>
    %cst_9 = arith.constant 1.000000e+00 : f32
    %12 = vector.broadcast %cst_9 : f32 to vector<16x32xf32>
    %13 = arith.addf %12, %11 : vector<16x32xf32>
    %14 = arith.divf %12, %13 : vector<16x32xf32>
    %15 = arith.mulf %14, %6 : vector<16x32xf32>
    %c0_10 = arith.constant 0 : index
    %c0_11 = arith.constant 0 : index
    %16 = vector.load %arg5[%c0_10, %c0_11] : memref<16x32xf32, #tpu.memory_space<vmem>>, vector<16x32xf32>
    tpu.vector_store %arg5[%c0_10, %c0_11], %15 {strides = array<i32>} : memref<16x32xf32, #tpu.memory_space<vmem>>, vector<16x32xf32>,
    return
  }
  func.func @transform_0(%arg0: i32, %arg1: i32) -> (i32, i32) {
    %c0_i32 = arith.constant 0 : i32
    %c0_i32_0 = arith.constant 0 : i32
    return %arg1, %c0_i32 : i32, i32
  }
  func.func @transform_1(%arg0: i32, %arg1: i32) -> (i32, i32, i32) {
    %c0_i32 = arith.constant 0 : i32
    %c0_i32_0 = arith.constant 0 : i32
    %c0_i32_1 = arith.constant 0 : i32
    return %c0_i32, %c0_i32_0, %arg0 : i32, i32, i32
  }
  func.func @transform_2(%arg0: i32, %arg1: i32) -> (i32, i32) {
    %c0_i32 = arith.constant 0 : i32
    %c0_i32_0 = arith.constant 0 : i32
    return %c0_i32, %arg0 : i32, i32
  }
  func.func @transform_3(%arg0: i32, %arg1: i32) -> (i32, i32) {
    %c0_i32 = arith.constant 0 : i32
    return %arg1, %arg0 : i32, i32
  }
}

</mosaic_0001>

<bundles_post_ra>
// kernel: gated_highway.1
= control target key start
LH: loop header
LB: loop body
LE: loop exit
PB: predicated region body
PF: predicated region fallthrough
CT: control target
= control target key end

     0   :  { %8 = vsyncpa [#allocation3], 0  ;;  %s424_s0 = inlined_call_operand.hbm [shape: f32[16,32], index: 0, kind: input, shape index: {}]   ;;  %s425_s1 = inlined_call_operand.hbm [shape: f32[2,32,32], index: 1, kind: input, shape index: {}]   ;;  %s426_s2 = inlined_call_operand.vmem [shape: f32[1,32], index: 2, kind: input, shape index: {}]   ;;  %s427_s3 = inlined_call_operand.hbm [shape: f32[16,32], index: 3, kind: output, shape index: {}]  }
   0x1   :  { %9 = vsyncpa [#allocation6], 0 }
   0x2   :  { %10 = vsyncpa [#allocation4], 0  ;;  %s372_s12 = smov [#allocation2]  }
   0x3   :  { %s16_s13 = sshll.u32 %s372_s12, 4  ;;  %s17_s13 = int_to_ptr.vmem [resolvable:$true] %s16_s13 }
   0x4   :  { %s314_s14 = scalar_lea.vmem %s17_s13, 256  ;;  %p319_p1 = scmp.lt.s32.totalorder %s17_s13, %s17_s13 }
   0x5   :  { %p315_p0 = scmp.ne.s32.totalorder %s17_s13, %s314_s14  ;;  %p320_p2 = scmp.lt.s32.totalorder %s314_s14, %s314_s14 }
   0x7   :  { %p321_p3 = por %p320_p2, %p319_p1 }
   0x9   :  { %p322_p4 = pnand %p321_p3, %p315_p0 }
   0xb   :  { %325 = shalt.err (!%p322_p4)
}
   0xc   :  { %s373_s15 = smov 128   ;;  %s374_s16 = smov 8  }
   0xd   :  { %22 = dma.hbm_to_vmem [thread:$0]  %s424_s0, 256, %s17_s13, [#allocation3], %s373_s15, %s373_s15, %s374_s16  }
   0xe   :  { %s375_s19 = smov [#allocation5]  }
   0xf   :  { %s28_s20 = sshll.u32 %s375_s19, 4  ;;  %s29_s20 = int_to_ptr.vmem [resolvable:$true] %s28_s20 }
  0x10   :  { %s334_s21 = scalar_lea.vmem %s29_s20, 1024  ;;  %p339_p6 = scmp.lt.s32.totalorder %s29_s20, %s29_s20 }
  0x11   :  { %p335_p5 = scmp.ne.s32.totalorder %s29_s20, %s334_s21  ;;  %p340_p7 = scmp.lt.s32.totalorder %s334_s21, %s334_s21 }
  0x13   :  { %p341_p8 = por %p340_p7, %p339_p6 }
  0x15   :  { %p342_p9 = pnand %p341_p8, %p335_p5 }
  0x17   :  { %345 = shalt.err (!%p342_p9)
}
  0x18   :  { %34 = dma.hbm_to_vmem [thread:$0]  %s425_s1, 1024, %s29_s20, [#allocation6], %s373_s15, %s373_s15, %s374_s16  }
  0x19   :  { %366 = dma.done.wait [#allocation3], 256  }
  0x1a   :  { %367 = vsyncadd [#allocation3], 4294967040 }
  0x1b   :  { %368 = dma.done.wait [#allocation6], 1024  }
  0x1c   :  { %369 = vsyncadd [#allocation6], 4294966272  ;;  %vm54_vm0 = vcmask 261120   ;;  %v48_v0 = vld [vmem:[#allocation5 + $0x18] sm:$0xff]  ;;  %v47_v1 = vld [vmem:[#allocation5 + $0x10] sm:$0xff]  ;;  %s376_s24 = smov [#allocation7]  }
  0x1d   :  { %282 = vmatprep.subr.mxu1 %v48_v0  ;;  %v43_v2 = vld [vmem:[#allocation2] sm:$0xff]  ;;  %v46_v3 = vld [vmem:[#allocation5 + $0x8] sm:$0xff]  ;;  %v53_v4 = vld [vmem:[#allocation5 + $0x38] sm:$0xff]  ;;  %s239_s25 = sshll.u32 %s376_s24, 4  ;;  %s240_s25 = int_to_ptr.vmem [resolvable:$true] %s239_s25 }
  0x1e   :  { %283 = vmatpush3.msra.mxu1 %v48_v0  ;;  %290 = vmatprep.mubr.msk.f32.mxu1 %vm54_vm0, %v43_v2  ;;  %v52_v5 = vld [vmem:[#allocation5 + $0x30] sm:$0xff]  ;;  %v45_v6 = vld [vmem:[#allocation5] sm:$0xff]  ;;  %v51_v7 = vld [vmem:[#allocation5 + $0x28] sm:$0xff]  ;;  %p351_p11 = scmp.lt.s32.totalorder %s240_s25, %s240_s25 }
  0x1f   :  { %284 = vmatprep.subr.mxu1 %v47_v1  ;;  %271 = vmatprep.subr.mxu0 %v53_v4  ;;  %v44_v8 = vld [vmem:[#allocation2 + $0x8] sm:$0xff]  ;;  %v50_v9 = vld [vmem:[#allocation5 + $0x20] sm:$0xff]  ;;  %v254_v10 = vld [vmem:[%s426_s2] ss:$0 sm:$0xff]  ;;  %s346_s2 = scalar_lea.vmem %s240_s25, 256 }
  0x20   :  { %285 = vmatpush3.msra.mxu1 %v47_v1  ;;  %272 = vmatpush3.msra.mxu0 %v53_v4  ;;  %p347_p10 = scmp.ne.s32.totalorder %s240_s25, %s346_s2  ;;  %p352_p12 = scmp.lt.s32.totalorder %s346_s2, %s346_s2 }
  0x21   :  { %286 = vmatprep.subr.mxu1 %v46_v3  ;;  %273 = vmatprep.subr.mxu0 %v52_v5 }
  0x22   :  { %287 = vmatpush3.msra.mxu1 %v46_v3  ;;  %274 = vmatpush3.msra.mxu0 %v52_v5  ;;  %p353_p13 = por %p352_p12, %p351_p11 }
  0x23   :  { %288 = vmatprep.subr.mxu1 %v45_v6  ;;  %275 = vmatprep.subr.mxu0 %v51_v7 }
  0x24   :  { %289 = vmatpush3.msra.mxu1 %v45_v6  ;;  %276 = vmatpush3.msra.mxu0 %v51_v7  ;;  %p354_p0 = pnand %p353_p13, %p347_p10 }
  0x25   :  { %291 = vmatmul.mubr.msk.f32.vlgmr.msra.gmra.mxu1 %vm54_vm0, %v44_v8  ;;  %277 = vmatprep.subr.mxu0 %v50_v9 }
  0x26   :  { %278 = vmatpush3.msra.mxu0 %v50_v9  ;;  %279 = vmatprep.mubr.msk.f32.mxu0 %vm54_vm0, %v43_v2 }
  0x27   :  { %280 = vmatmul.mubr.msk.f32.vlgmr.msra.gmra.mxu0 %vm54_vm0, %v44_v8 }
  0xe5   :  { %v292_v11 = vpop.f32.mrf.mxu1 }
  0xe6   :  { %v215_v12 = vadd.f32 %v292_v11, %v254_v10 }
  0xe7   :  { %v209_v13 = vpop.f32.mrf.mxu1  ;;  %v281_v21 = vpop.f32.mrf.mxu0 }
  0xe8   :  { %v258_v14 = vmul.f32 -1.442695, %v215_v12  ;;  %v210_v15 = vadd.f32 %v254_v10, %v209_v13 }
  0xe9   :  { %v127_v25 = vpop.f32.mrf.mxu0 }
  0xea   :  { %298 = vpow2.f32 %v258_v14  ;;  %v257_v16 = vmul.f32 -1.442695, %v210_v15 }
  0xec   :  { %300 = vpow2.f32 %v257_v16 }
  0xf7   :  { %v299_v17 = vpop.eup %298 }
  0xf8   :  { %v225_v18 = vadd.f32 1.0, %v299_v17 }
  0xf9   :  { %v301_v19 = vpop.eup %300 }
  0xfa   :  { %302 = vrcp.f32 %v225_v18  ;;  %v224_v20 = vadd.f32 1.0, %v301_v19 }
  0xfc   :  { %304 = vrcp.f32 %v224_v20 }
 0x107   :  { %v303_v22 = vpop.eup %302 }
 0x108   :  { %v231_v23 = vmul.f32 %v303_v22, %v281_v21 }
 0x109   :  { %v305_v24 = vpop.eup %304 }
 0x10a   :  { %233 = vst.msk [vmem:[#allocation7 + $0x8] sm:$0xff] %vm54_vm0, %v231_v23  ;;  %v230_v26 = vmul.f32 %v305_v24, %v127_v25 }
 0x10c   :  { %232 = vst.msk [vmem:[#allocation7] sm:$0xff] %vm54_vm0, %v230_v26 }
 0x10d   :  { %357 = shalt.err (!%p354_p0)
}
 0x10e   :  { %245 = dma.vmem_to_hbm [thread:$0]  %s240_s25, 256, %s427_s3, [#allocation4], %s373_s15, %s373_s15, %s374_s16  }
 0x10f   :  { %370 = dma.done.wait [#allocation4], 256  }
 0x110   :  { %371 = vsyncadd [#allocation4], 4294967040 }
 0x111   :  { %249 = vsyncpa [#allocation3], 1 }
 0x112   :  { %250 = vsyncpa [#allocation6], 1 }
 0x113   :  { %251 = vsyncpa [#allocation4], 1 }

</bundles_post_ra>
